<compile_context>
chip_gen: v7x
topology: tpu7x:2x2x1
jax: 0.10.0
libtpu: 0.0.40
codegen_flags: <defaults>
</compile_context>

<pallas_src>
import jax
import jax.numpy as jnp
from jax.experimental import pallas as pl
from jax.experimental.pallas import tpu as pltpu


_VMEM = pl.BlockSpec(memory_space=pltpu.MemorySpace.VMEM)
_VMEM_LIMIT = 32 * 1024 * 1024


# -----------------------------------------------------------------------------
# Pallas kernels
# -----------------------------------------------------------------------------
def _make_conv_kernel(offsets, out_rows, relu, has_residual):
    """act( sum_t x[off_t : off_t + out_rows, :] @ W_t + bias [+ residual] ).

    x_ref  : (XR, Cin)  bf16  padded, spatially-flattened activation (one image).
    w_ref  : (T, Cin, Cout) bf16 per-tap weights (BN scale pre-folded).
    b_ref  : (1, Cout)  f32   folded BN bias.
    r_ref  : (out_rows, Cout) bf16 optional residual (already in flattened layout).
    o_ref  : (out_rows, Cout) bf16 output.
    """
    single_identity_tap = (len(offsets) == 1 and offsets[0] == 0)

    def kernel(x_ref, w_ref, b_ref, *rest):
        if has_residual:
            r_ref, o_ref = rest
        else:
            (o_ref,) = rest
        cout = w_ref.shape[-1]

        if single_identity_tap:
            # 1x1 conv: plain matmul, no shifted views needed.
            acc = jnp.dot(x_ref[...], w_ref[0], preferred_element_type=jnp.float32)
        else:
            # Stage the (small) padded activation once in f32 so the 9 shifted tap
            # views are plain 32-bit sublane slices; feed the MXU in bf16.
            xx = x_ref[...].astype(jnp.float32)
            acc = jnp.zeros((out_rows, cout), jnp.float32)
            for t, off in enumerate(offsets):
                xs = xx[off:off + out_rows, :].astype(jnp.bfloat16)
                acc = acc + jnp.dot(xs, w_ref[t], preferred_element_type=jnp.float32)

        y = acc + b_ref[...]
        if has_residual:
            y = y + r_ref[...].astype(jnp.float32)
        if relu:
            y = jnp.maximum(y, 0.0)
        o_ref[...] = y.astype(o_ref.dtype)

    return kernel


def _conv_call(xp, w, b, *, out_rows, offsets, relu, residual):
    """Grid over the batch ("parallel" -> v7x dual-TC); weights/bias stay resident."""
    N, XR, Cin = xp.shape
    T, _, Cout = w.shape
    kernel = _make_conv_kernel(tuple(offsets), out_rows, relu, residual is not None)

    in_specs = [
        pl.BlockSpec((None, XR, Cin), lambda n: (n, 0, 0)),
        pl.BlockSpec((T, Cin, Cout), lambda n: (0, 0, 0)),
        pl.BlockSpec((1, Cout), lambda n: (0, 0)),
    ]
    inputs = [xp, w, b]
    if residual is not None:
        in_specs.append(pl.BlockSpec((None, out_rows, Cout), lambda n: (n, 0, 0)))
        inputs.append(residual)

    return pl.pallas_call(
        kernel,
        grid=(N,),
        out_shape=jax.ShapeDtypeStruct((N, out_rows, Cout), jnp.bfloat16),
        in_specs=in_specs,
        out_specs=pl.BlockSpec((None, out_rows, Cout), lambda n: (n, 0, 0)),
        compiler_params=pltpu.CompilerParams(
            dimension_semantics=("parallel",),
            vmem_limit_bytes=_VMEM_LIMIT),
    )(*inputs)


def _head_kernel(xf_ref, pool_ref, w1, b1, w2, b2, w3, b3, w4, b4,
                 h_ref, proj_ref, pred_ref):
    """Fused: global-average-pool (as a tiny matmul) + projection MLP + prediction MLP."""
    h = jnp.dot(pool_ref[...], xf_ref[...], preferred_element_type=jnp.float32)   # (N, C)
    h_ref[...] = h.astype(h_ref.dtype)

    z = jnp.dot(h.astype(jnp.bfloat16), w1[...], preferred_element_type=jnp.float32) + b1[...]
    z = jnp.maximum(z, 0.0)
    proj = jnp.dot(z.astype(jnp.bfloat16), w2[...], preferred_element_type=jnp.float32) + b2[...]
    proj_ref[...] = proj.astype(proj_ref.dtype)

    z = jnp.dot(proj.astype(jnp.bfloat16), w3[...], preferred_element_type=jnp.float32) + b3[...]
    z = jnp.maximum(z, 0.0)
    pred = jnp.dot(z.astype(jnp.bfloat16), w4[...], preferred_element_type=jnp.float32) + b4[...]
    pred_ref[...] = pred.astype(pred_ref.dtype)


# -----------------------------------------------------------------------------
# Conv / head wrappers (plain-JAX glue is only cheap pads / reshapes / slices)
# -----------------------------------------------------------------------------
def conv3x3_bn(x, w, b, *, stride=1, relu=True, residual=None):
    """3x3 'same' conv (+folded-BN bias, +residual, +ReLU), in-kernel tap accumulation."""
    N, H, W, Cin = x.shape
    T, Cin_w, Cout = w.shape
    if Cin != Cin_w:                               # stem: pad 3 -> 8 input channels
        x = jnp.pad(x, ((0, 0), (0, 0), (0, 0), (0, Cin_w - Cin)))
        Cin = Cin_w
    Wp = W + 2
    out_rows = H * Wp
    xp = jnp.pad(x, ((0, 0), (1, 2), (1, 1), (0, 0))).reshape(N, (H + 3) * Wp, Cin)
    offsets = [di * Wp + dj for di in range(3) for dj in range(3)]
    r = None
    if residual is not None:                       # residual path is always stride == 1
        r = jnp.pad(residual, ((0, 0), (0, 0), (0, 2), (0, 0))).reshape(N, out_rows, Cout)
    o = _conv_call(xp, w, b, out_rows=out_rows, offsets=offsets, relu=relu, residual=r)
    y = o.reshape(N, H, Wp, Cout)[:, :, :W, :]
    if stride == 2:
        y = y[:, ::2, ::2, :]
    return y


def conv1x1_bn(x, w, b, *, stride=1):
    """1x1 conv with stride: subsample first (exact for 1x1), then a single-tap matmul."""
    xs = x[:, ::stride, ::stride, :]
    N, Ho, Wo, Cin = xs.shape
    Cout = w.shape[-1]
    xf = xs.reshape(N, Ho * Wo, Cin)
    o = _conv_call(xf, w, b, out_rows=Ho * Wo, offsets=[0], relu=False, residual=None)
    return o.reshape(N, Ho, Wo, Cout)


def pooled_mlp_head(feat, mlp):
    """feat: (N, Hf, Wf, C) bf16 -> (h, proj, pred); one fused Pallas call."""
    N, Hf, Wf, C = feat.shape
    S = Hf * Wf
    xf = feat.reshape(N * S, C)
    pool = (jnp.repeat(jnp.eye(N, dtype=jnp.float32), S, axis=1) / float(S)).astype(jnp.bfloat16)
    out_dim = mlp['proj_w1'].shape[-1]
    return pl.pallas_call(
        _head_kernel,
        out_shape=(jax.ShapeDtypeStruct((N, C), jnp.float32),
                   jax.ShapeDtypeStruct((N, out_dim), jnp.float32),
                   jax.ShapeDtypeStruct((N, out_dim), jnp.float32)),
        in_specs=[_VMEM] * 10,
        out_specs=(_VMEM, _VMEM, _VMEM),
        compiler_params=pltpu.CompilerParams(vmem_limit_bytes=_VMEM_LIMIT),
    )(xf, pool,
      mlp['proj_w1'], mlp['proj_b1'], mlp['proj_w2'], mlp['proj_b2'],
      mlp['pred_w1'], mlp['pred_b1'], mlp['pred_w2'], mlp['pred_b2'])


# -----------------------------------------------------------------------------
# Deterministic parameter init + one-time BN-fold / bf16 cast
# -----------------------------------------------------------------------------
def _init_conv(key, kh, kw, cin, cout):
    fan_in = kh * kw * cin
    return jax.random.normal(key, (kh, kw, cin, cout), jnp.float32) * (2.0 / fan_in) ** 0.5


def _init_bn(key, c):
    k1, k2 = jax.random.split(key)
    return (1.0 + 0.1 * jax.random.normal(k1, (c,), jnp.float32),
            0.1 * jax.random.normal(k2, (c,), jnp.float32))


def _init_linear(key, din, dout):
    k1, k2 = jax.random.split(key)
    return (jax.random.normal(k1, (din, dout), jnp.float32) * (1.0 / din) ** 0.5,
            0.01 * jax.random.normal(k2, (dout,), jnp.float32))


def init_params(key, out_dim):
    keys = iter(jax.random.split(key, 256))
    params = {'conv1_w': _init_conv(next(keys), 3, 3, 3, 64)}
    params['bn1_s'], params['bn1_b'] = _init_bn(next(keys), 64)

    widths = [64, 128, 256, 512]
    in_c = 64
    layers = []
    for li, w_out in enumerate(widths):
        blocks = []
        for bi in range(2):
            stride = 2 if (li > 0 and bi == 0) else 1
            blk = {}
            blk['conv1_w'] = _init_conv(next(keys), 3, 3, in_c, w_out)
            blk['bn1_s'], blk['bn1_b'] = _init_bn(next(keys), w_out)
            blk['conv2_w'] = _init_conv(next(keys), 3, 3, w_out, w_out)
            blk['bn2_s'], blk['bn2_b'] = _init_bn(next(keys), w_out)
            if stride != 1 or in_c != w_out:
                blk['down_w'] = _init_conv(next(keys), 1, 1, in_c, w_out)
                blk['dbn_s'], blk['dbn_b'] = _init_bn(next(keys), w_out)
            blocks.append(blk)
            in_c = w_out
        layers.append(blocks)
    params['layers'] = layers
    num_ftrs = widths[-1]

    mlp = {}
    mlp['proj_w1'], mlp['proj_b1'] = _init_linear(next(keys), num_ftrs, out_dim)
    mlp['proj_w2'], mlp['proj_b2'] = _init_linear(next(keys), out_dim, out_dim)
    mlp['pred_w1'], mlp['pred_b1'] = _init_linear(next(keys), out_dim, out_dim)
    mlp['pred_w2'], mlp['pred_b2'] = _init_linear(next(keys), out_dim, out_dim)
    return params, mlp, num_ftrs


def _fold_conv(w, gamma, beta):
    """Fold eval-mode BN (mean=0, var=1) scale into the conv weights; (taps, Cin, Cout) bf16."""
    kh, kw, cin, cout = w.shape
    wf = (w * gamma.reshape(1, 1, 1, cout)).reshape(kh * kw, cin, cout)
    pad = (-cin) % 8
    if pad:
        wf = jnp.pad(wf, ((0, 0), (0, pad), (0, 0)))
    return wf.astype(jnp.bfloat16), beta.reshape(1, cout).astype(jnp.float32)


def fold_params(params, mlp):
    fp = {}
    fp['conv1_w'], fp['conv1_b'] = _fold_conv(params['conv1_w'], params['bn1_s'], params['bn1_b'])
    blocks = []
    for layer in params['layers']:
        for blk in layer:
            fb = {}
            fb['conv1_w'], fb['conv1_b'] = _fold_conv(blk['conv1_w'], blk['bn1_s'], blk['bn1_b'])
            fb['conv2_w'], fb['conv2_b'] = _fold_conv(blk['conv2_w'], blk['bn2_s'], blk['bn2_b'])
            if 'down_w' in blk:
                fb['down_w'], fb['down_b'] = _fold_conv(blk['down_w'], blk['dbn_s'], blk['dbn_b'])
            blocks.append(fb)
    fp['blocks'] = blocks
    fmlp = {}
    for name in ('proj_w1', 'proj_w2', 'pred_w1', 'pred_w2'):
        fmlp[name] = mlp[name].astype(jnp.bfloat16)
    for name in ('proj_b1', 'proj_b2', 'pred_b1', 'pred_b2'):
        fmlp[name] = mlp[name].reshape(1, -1).astype(jnp.float32)
    fp['mlp'] = fmlp
    return fp


# -----------------------------------------------------------------------------
# Forward pass (mirrors ModelFedX.forward)
# -----------------------------------------------------------------------------
def basic_block(x, fb):
    stride = 2 if 'down_w' in fb else 1      # in ResNet18-cifar10, downsample <=> stride 2
    out = conv3x3_bn(x, fb['conv1_w'], fb['conv1_b'], stride=stride, relu=True)
    if 'down_w' in fb:
        shortcut = conv1x1_bn(x, fb['down_w'], fb['down_b'], stride=stride)
    else:
        shortcut = x
    # conv2 + BN + residual add + final ReLU fused in one kernel
    return conv3x3_bn(out, fb['conv2_w'], fb['conv2_b'], stride=1, relu=True, residual=shortcut)


@jax.jit
def fedx_forward(x_nchw, fp):
    x = jnp.transpose(x_nchw, (0, 2, 3, 1)).astype(jnp.bfloat16)   # NCHW -> NHWC, bf16 for the MXU
    h = conv3x3_bn(x, fp['conv1_w'], fp['conv1_b'], stride=1, relu=True)
    for fb in fp['blocks']:
        h = basic_block(h, fb)
    # NOTE: PyTorch's h.squeeze() would also drop the batch dim for N==1; we keep (N, num_ftrs).
    return pooled_mlp_head(h, fp['mlp'])       # (h, proj, pred) — avgpool + 4 linears in one call


# -----------------------------------------------------------------------------
# Small correctness self-test of the in-kernel tap-accumulation conv
# -----------------------------------------------------------------------------
def _ref_conv3x3(x, w_taps, b, stride, relu, residual):
    T, cin, cout = w_taps.shape
    w = w_taps.astype(jnp.float32).reshape(3, 3, cin, cout)
    y = jax.lax.conv_general_dilated(
        x.astype(jnp.float32), w, (stride, stride), ((1, 1), (1, 1)),
        dimension_numbers=('NHWC', 'HWIO', 'NHWC'),
        precision=jax.lax.Precision.HIGHEST)
    y = y + b.reshape(1, 1, 1, cout)
    if residual is not None:
        y = y + residual.astype(jnp.float32)
    if relu:
        y = jnp.maximum(y, 0.0)
    return y


def _self_test_conv():
    key = jax.random.PRNGKey(1)
    kx, kw, kb, kr, kw2, kb2 = jax.random.split(key, 6)
    x = jax.random.normal(kx, (2, 8, 8, 16), jnp.float32).astype(jnp.bfloat16)
    w = (jax.random.normal(kw, (9, 16, 32), jnp.float32) * 0.1).astype(jnp.bfloat16)
    b = jax.random.normal(kb, (1, 32), jnp.float32) * 0.1
    r = jax.random.normal(kr, (2, 8, 8, 32), jnp.float32).astype(jnp.bfloat16)

    got = conv3x3_bn(x, w, b, stride=1, relu=True, residual=r).astype(jnp.float32)
    want = _ref_conv3x3(x, w, b, 1, True, r)
    assert float(jnp.max(jnp.abs(got - want))) < 1e-1

    w2 = (jax.random.normal(kw2, (9, 16, 32), jnp.float32) * 0.1).astype(jnp.bfloat16)
    b2 = jax.random.normal(kb2, (1, 32), jnp.float32) * 0.1
    got2 = conv3x3_bn(x, w2, b2, stride=2, relu=False).astype(jnp.float32)
    want2 = _ref_conv3x3(x, w2, b2, 2, False, None)
    assert float(jnp.max(jnp.abs(got2 - want2))) < 1e-1


# -----------------------------------------------------------------------------
if __name__ == "__main__":
    key = jax.random.PRNGKey(0)
    k_param, k_x = jax.random.split(key)

    _self_test_conv()

    OUT_DIM = 128
    params, mlp, num_ftrs = init_params(k_param, OUT_DIM)
    fp = fold_params(params, mlp)

    # CIFAR-style input, batch=2, NCHW like PyTorch.
    x = jax.random.normal(k_x, (2, 3, 32, 32), jnp.float32)

    h, proj, pred = fedx_forward(x, fp)
    jax.block_until_ready((h, proj, pred))

    assert h.shape == (2, num_ftrs), h.shape
    assert proj.shape == (2, OUT_DIM), proj.shape
    assert pred.shape == (2, OUT_DIM), pred.shape
    assert all(bool(jnp.isfinite(t).all()) for t in (h, proj, pred))

    print("KERNEL_OK")
</pallas_src>

<mosaic_0001>
module attributes {stable_mosaic.version = 11 : i64} {
  func.func @kernel(%arg0: i32, %arg1: memref<1x110x16xbf16, #tpu.memory_space<vmem>>, %arg2: memref<9x16x32xbf16, #tpu.memory_space<vmem>>, %arg3: memref<1x32xf32, #tpu.memory_space<vmem>>, %arg4: memref<1x80x32xbf16, #tpu.memory_space<vmem>>, %arg5: memref<1x80x32xbf16, #tpu.memory_space<vmem>>) attributes {dimension_semantics = [#tpu.dimension_semantics<parallel>], iteration_bounds = array<i64: 2>, scalar_prefetch = 0 : i64, scratch_operands = 0 : i64, tpu.core_type = #tpu.core_type<tc>, window_params = [{transform_indices = @transform_0, window_bounds = array<i64: 1, 110, 16>}, {pipeline_mode = #tpu.pipeline_mode<synchronous>, transform_indices = @transform_1, window_bounds = array<i64: 9, 16, 32>}, {pipeline_mode = #tpu.pipeline_mode<synchronous>, transform_indices = @transform_2, window_bounds = array<i64: 1, 32>}, {transform_indices = @transform_3, window_bounds = array<i64: 1, 80, 32>}, {transform_indices = @transform_4, window_bounds = array<i64: 1, 80, 32>}]} {
    %c0 = arith.constant 0 : index
    %c0_0 = arith.constant 0 : index
    %c0_1 = arith.constant 0 : index
    %0 = vector.load %arg1[%c0, %c0_0, %c0_1] : memref<1x110x16xbf16, #tpu.memory_space<vmem>>, vector<1x110x16xbf16>
    %1 = vector.shape_cast %0 : vector<1x110x16xbf16> to vector<110x16xbf16>
    %2 = arith.extf %1 : vector<110x16xbf16> to vector<110x16xf32>
    %cst = arith.constant 0.000000e+00 : f32
    %3 = vector.broadcast %cst : f32 to vector<80x32xf32>
    %4 = vector.extract_strided_slice %2 {offsets = [0, 0], sizes = [80, 16], strides = [1, 1]} : vector<110x16xf32> to vector<80x16xf32>
    %5 = arith.truncf %4 : vector<80x16xf32> to vector<80x16xbf16>
    %c0_2 = arith.constant 0 : index
    %c0_3 = arith.constant 0 : index
    %c0_4 = arith.constant 0 : index
    %6 = vector.load %arg2[%c0_2, %c0_3, %c0_4] : memref<9x16x32xbf16, #tpu.memory_space<vmem>>, vector<1x16x32xbf16>
    %7 = vector.shape_cast %6 : vector<1x16x32xbf16> to vector<16x32xbf16>
    %cst_5 = arith.constant dense<0.000000e+00> : vector<80x32xf32>
    %8 = tpu.matmul %5, %7, %cst_5 {dimension_numbers = #tpu.dot_dimension_numbers<[1], [0], [0], [1], [0, 0, 1, 1], [], []>} : vector<80x16xbf16>, vector<16x32xbf16>, vector<80x32xf32> -> vector<80x32xf32>
    %9 = arith.addf %3, %8 : vector<80x32xf32>
    %10 = vector.extract_strided_slice %2 {offsets = [1, 0], sizes = [80, 16], strides = [1, 1]} : vector<110x16xf32> to vector<80x16xf32>
    %11 = arith.truncf %10 : vector<80x16xf32> to vector<80x16xbf16>
    %c1 = arith.constant 1 : index
    %c0_6 = arith.constant 0 : index
    %c0_7 = arith.constant 0 : index
    %12 = vector.load %arg2[%c1, %c0_6, %c0_7] : memref<9x16x32xbf16, #tpu.memory_space<vmem>>, vector<1x16x32xbf16>
    %13 = vector.shape_cast %12 : vector<1x16x32xbf16> to vector<16x32xbf16>
    %cst_8 = arith.constant dense<0.000000e+00> : vector<80x32xf32>
    %14 = tpu.matmul %11, %13, %cst_8 {dimension_numbers = #tpu.dot_dimension_numbers<[1], [0], [0], [1], [0, 0, 1, 1], [], []>} : vector<80x16xbf16>, vector<16x32xbf16>, vector<80x32xf32> -> vector<80x32xf32>
    %15 = arith.addf %9, %14 : vector<80x32xf32>
    %16 = vector.extract_strided_slice %2 {offsets = [2, 0], sizes = [80, 16], strides = [1, 1]} : vector<110x16xf32> to vector<80x16xf32>
    %17 = arith.truncf %16 : vector<80x16xf32> to vector<80x16xbf16>
    %c2 = arith.constant 2 : index
    %c0_9 = arith.constant 0 : index
    %c0_10 = arith.constant 0 : index
    %18 = vector.load %arg2[%c2, %c0_9, %c0_10] : memref<9x16x32xbf16, #tpu.memory_space<vmem>>, vector<1x16x32xbf16>
    %19 = vector.shape_cast %18 : vector<1x16x32xbf16> to vector<16x32xbf16>
    %cst_11 = arith.constant dense<0.000000e+00> : vector<80x32xf32>
    %20 = tpu.matmul %17, %19, %cst_11 {dimension_numbers = #tpu.dot_dimension_numbers<[1], [0], [0], [1], [0, 0, 1, 1], [], []>} : vector<80x16xbf16>, vector<16x32xbf16>, vector<80x32xf32> -> vector<80x32xf32>
    %21 = arith.addf %15, %20 : vector<80x32xf32>
    %22 = vector.extract_strided_slice %2 {offsets = [10, 0], sizes = [80, 16], strides = [1, 1]} : vector<110x16xf32> to vector<80x16xf32>
    %23 = arith.truncf %22 : vector<80x16xf32> to vector<80x16xbf16>
    %c3 = arith.constant 3 : index
    %c0_12 = arith.constant 0 : index
    %c0_13 = arith.constant 0 : index
    %24 = vector.load %arg2[%c3, %c0_12, %c0_13] : memref<9x16x32xbf16, #tpu.memory_space<vmem>>, vector<1x16x32xbf16>
    %25 = vector.shape_cast %24 : vector<1x16x32xbf16> to vector<16x32xbf16>
    %cst_14 = arith.constant dense<0.000000e+00> : vector<80x32xf32>
    %26 = tpu.matmul %23, %25, %cst_14 {dimension_numbers = #tpu.dot_dimension_numbers<[1], [0], [0], [1], [0, 0, 1, 1], [], []>} : vector<80x16xbf16>, vector<16x32xbf16>, vector<80x32xf32> -> vector<80x32xf32>
    %27 = arith.addf %21, %26 : vector<80x32xf32>
    %28 = vector.extract_strided_slice %2 {offsets = [11, 0], sizes = [80, 16], strides = [1, 1]} : vector<110x16xf32> to vector<80x16xf32>
    %29 = arith.truncf %28 : vector<80x16xf32> to vector<80x16xbf16>
    %c4 = arith.constant 4 : index
    %c0_15 = arith.constant 0 : index
    %c0_16 = arith.constant 0 : index
    %30 = vector.load %arg2[%c4, %c0_15, %c0_16] : memref<9x16x32xbf16, #tpu.memory_space<vmem>>, vector<1x16x32xbf16>
    %31 = vector.shape_cast %30 : vector<1x16x32xbf16> to vector<16x32xbf16>
    %cst_17 = arith.constant dense<0.000000e+00> : vector<80x32xf32>
    %32 = tpu.matmul %29, %31, %cst_17 {dimension_numbers = #tpu.dot_dimension_numbers<[1], [0], [0], [1], [0, 0, 1, 1], [], []>} : vector<80x16xbf16>, vector<16x32xbf16>, vector<80x32xf32> -> vector<80x32xf32>
    %33 = arith.addf %27, %32 : vector<80x32xf32>
    %34 = vector.extract_strided_slice %2 {offsets = [12, 0], sizes = [80, 16], strides = [1, 1]} : vector<110x16xf32> to vector<80x16xf32>
    %35 = arith.truncf %34 : vector<80x16xf32> to vector<80x16xbf16>
    %c5 = arith.constant 5 : index
    %c0_18 = arith.constant 0 : index
    %c0_19 = arith.constant 0 : index
    %36 = vector.load %arg2[%c5, %c0_18, %c0_19] : memref<9x16x32xbf16, #tpu.memory_space<vmem>>, vector<1x16x32xbf16>
    %37 = vector.shape_cast %36 : vector<1x16x32xbf16> to vector<16x32xbf16>
    %cst_20 = arith.constant dense<0.000000e+00> : vector<80x32xf32>
    %38 = tpu.matmul %35, %37, %cst_20 {dimension_numbers = #tpu.dot_dimension_numbers<[1], [0], [0], [1], [0, 0, 1, 1], [], []>} : vector<80x16xbf16>, vector<16x32xbf16>, vector<80x32xf32> -> vector<80x32xf32>
    %39 = arith.addf %33, %38 : vector<80x32xf32>
    %40 = vector.extract_strided_slice %2 {offsets = [20, 0], sizes = [80, 16], strides = [1, 1]} : vector<110x16xf32> to vector<80x16xf32>
    %41 = arith.truncf %40 : vector<80x16xf32> to vector<80x16xbf16>
    %c6 = arith.constant 6 : index
    %c0_21 = arith.constant 0 : index
    %c0_22 = arith.constant 0 : index
    %42 = vector.load %arg2[%c6, %c0_21, %c0_22] : memref<9x16x32xbf16, #tpu.memory_space<vmem>>, vector<1x16x32xbf16>
    %43 = vector.shape_cast %42 : vector<1x16x32xbf16> to vector<16x32xbf16>
    %cst_23 = arith.constant dense<0.000000e+00> : vector<80x32xf32>
    %44 = tpu.matmul %41, %43, %cst_23 {dimension_numbers = #tpu.dot_dimension_numbers<[1], [0], [0], [1], [0, 0, 1, 1], [], []>} : vector<80x16xbf16>, vector<16x32xbf16>, vector<80x32xf32> -> vector<80x32xf32>
    %45 = arith.addf %39, %44 : vector<80x32xf32>
    %46 = vector.extract_strided_slice %2 {offsets = [21, 0], sizes = [80, 16], strides = [1, 1]} : vector<110x16xf32> to vector<80x16xf32>
    %47 = arith.truncf %46 : vector<80x16xf32> to vector<80x16xbf16>
    %c7 = arith.constant 7 : index
    %c0_24 = arith.constant 0 : index
    %c0_25 = arith.constant 0 : index
    %48 = vector.load %arg2[%c7, %c0_24, %c0_25] : memref<9x16x32xbf16, #tpu.memory_space<vmem>>, vector<1x16x32xbf16>
    %49 = vector.shape_cast %48 : vector<1x16x32xbf16> to vector<16x32xbf16>
    %cst_26 = arith.constant dense<0.000000e+00> : vector<80x32xf32>
    %50 = tpu.matmul %47, %49, %cst_26 {dimension_numbers = #tpu.dot_dimension_numbers<[1], [0], [0], [1], [0, 0, 1, 1], [], []>} : vector<80x16xbf16>, vector<16x32xbf16>, vector<80x32xf32> -> vector<80x32xf32>
    %51 = arith.addf %45, %50 : vector<80x32xf32>
    %52 = vector.extract_strided_slice %2 {offsets = [22, 0], sizes = [80, 16], strides = [1, 1]} : vector<110x16xf32> to vector<80x16xf32>
    %53 = arith.truncf %52 : vector<80x16xf32> to vector<80x16xbf16>
    %c8 = arith.constant 8 : index
    %c0_27 = arith.constant 0 : index
    %c0_28 = arith.constant 0 : index
    %54 = vector.load %arg2[%c8, %c0_27, %c0_28] : memref<9x16x32xbf16, #tpu.memory_space<vmem>>, vector<1x16x32xbf16>
    %55 = vector.shape_cast %54 : vector<1x16x32xbf16> to vector<16x32xbf16>
    %cst_29 = arith.constant dense<0.000000e+00> : vector<80x32xf32>
    %56 = tpu.matmul %53, %55, %cst_29 {dimension_numbers = #tpu.dot_dimension_numbers<[1], [0], [0], [1], [0, 0, 1, 1], [], []>} : vector<80x16xbf16>, vector<16x32xbf16>, vector<80x32xf32> -> vector<80x32xf32>
    %57 = arith.addf %51, %56 : vector<80x32xf32>
    %c0_30 = arith.constant 0 : index
    %c0_31 = arith.constant 0 : index
    %58 = vector.load %arg3[%c0_30, %c0_31] : memref<1x32xf32, #tpu.memory_space<vmem>>, vector<1x32xf32>
    %59 = vector.broadcast %58 : vector<1x32xf32> to vector<80x32xf32>
    %60 = arith.addf %57, %59 : vector<80x32xf32>
    %c0_32 = arith.constant 0 : index
    %c0_33 = arith.constant 0 : index
    %c0_34 = arith.constant 0 : index
    %61 = vector.load %arg4[%c0_32, %c0_33, %c0_34] : memref<1x80x32xbf16, #tpu.memory_space<vmem>>, vector<1x80x32xbf16>
    %62 = vector.shape_cast %61 : vector<1x80x32xbf16> to vector<80x32xbf16>
    %63 = arith.extf %62 : vector<80x32xbf16> to vector<80x32xf32>
    %64 = arith.addf %60, %63 : vector<80x32xf32>
    %cst_35 = arith.constant 0.000000e+00 : f32
    %65 = vector.broadcast %cst_35 : f32 to vector<80x32xf32>
    %66 = arith.maximumf %64, %65 : vector<80x32xf32>
    %67 = arith.truncf %66 : vector<80x32xf32> to vector<80x32xbf16>
    %c0_36 = arith.constant 0 : index
    %c0_37 = arith.constant 0 : index
    %c0_38 = arith.constant 0 : index
    %68 = vector.load %arg5[%c0_36, %c0_37, %c0_38] : memref<1x80x32xbf16, #tpu.memory_space<vmem>>, vector<1x80x32xbf16>
    %69 = vector.shape_cast %68 : vector<1x80x32xbf16> to vector<80x32xbf16>
    %70 = vector.shape_cast %67 : vector<80x32xbf16> to vector<1x80x32xbf16>
    tpu.vector_store %arg5[%c0_36, %c0_37, %c0_38], %70 {strides = array<i32>} : memref<1x80x32xbf16, #tpu.memory_space<vmem>>, vector<1x80x32xbf16>,
    return
  }
  func.func @transform_0(%arg0: i32) -> (i32, i32, i32) {
    %c0_i32 = arith.constant 0 : i32
    %c0_i32_0 = arith.constant 0 : i32
    %c0_i32_1 = arith.constant 0 : i32
    return %arg0, %c0_i32, %c0_i32_0 : i32, i32, i32
  }
  func.func @transform_1(%arg0: i32) -> (i32, i32, i32) {
    %c0_i32 = arith.constant 0 : i32
    %c0_i32_0 = arith.constant 0 : i32
    %c0_i32_1 = arith.constant 0 : i32
    %c0_i32_2 = arith.constant 0 : i32
    return %c0_i32, %c0_i32_0, %c0_i32_1 : i32, i32, i32
  }
  func.func @transform_2(%arg0: i32) -> (i32, i32) {
    %c0_i32 = arith.constant 0 : i32
    %c0_i32_0 = arith.constant 0 : i32
    %c0_i32_1 = arith.constant 0 : i32
    return %c0_i32, %c0_i32_0 : i32, i32
  }
  func.func @transform_3(%arg0: i32) -> (i32, i32, i32) {
    %c0_i32 = arith.constant 0 : i32
    %c0_i32_0 = arith.constant 0 : i32
    %c0_i32_1 = arith.constant 0 : i32
    return %arg0, %c0_i32, %c0_i32_0 : i32, i32, i32
  }
  func.func @transform_4(%arg0: i32) -> (i32, i32, i32) {
    %c0_i32 = arith.constant 0 : i32
    %c0_i32_0 = arith.constant 0 : i32
    %c0_i32_1 = arith.constant 0 : i32
    return %arg0, %c0_i32, %c0_i32_0 : i32, i32, i32
  }
}

</mosaic_0001>

<bundles_post_ra>
// kernel: tpu_custom_call.1
= control target key start
LH: loop header
LB: loop body
LE: loop exit
PB: predicated region body
PF: predicated region fallthrough
CT: control target
= control target key end

     0   :  { %s2040_s15 = smov 0   ;;  %s2559_s0 = inlined_call_operand.vmem [shape: bf16[2,110,16], index: 0, kind: input, shape index: {}]   ;;  %s2560_s1 = inlined_call_operand.vmem [shape: bf16[9,16,32], index: 1, kind: input, shape index: {}]   ;;  %s2561_s2 = inlined_call_operand.vmem [shape: f32[1,32], index: 2, kind: input, shape index: {}]   ;;  %s2562_s3 = inlined_call_operand.vmem [shape: bf16[2,80,32], index: 3, kind: input, shape index: {}]   ;;  %s2563_s4 = inlined_call_operand.vmem [shape: bf16[2,80,32], index: 4, kind: output, shape index: {}]  }
   0x1 LB: > { %s1577_s16 = sadd.s32 4294967295, %s2011_s15   ;;  %p1581_p0 = scmp.ge.s32.totalorder %s2011_s15, 1  ;;  %s2011_s15 = sphi %s2040_s15, %s14_s15  }
   0x2   : > { %p172_p1 = scmp.lt.s32.totalorder %s2011_s15, 3 }
   0x4   : > { %p173_p2 = pnand %p1581_p0, %p172_p1 }
   0x5   : > { %v1982_v0 = vld [vmem:[%s2560_s1 + $0x8] sm:$0xff] (!%p173_p2)   ;;  %v2013_v1 = vmov (!%p173_p2), 0.0   ;;  %p203_p3 = scmp.lt.s32.totalorder (!%p173_p2), %s1577_s16, 1  ;;  %vm2014_vm0 = vmmov (!%p173_p2), 0   ;;  %vm256_vm1 = vsmask.f32 (!%p173_p2), 7424 }
   0x6   : > { %176 = sbr.rel (%p173_p2) target bundleno = 428 (0x1ac), region = 36  ;;  %1770 = vmatprep.subr.bf16.mxu0 (!%p173_p2), %v2013_v1  ;;  %1968 = vmatprep.subr.bf16.mxu1 (!%p173_p2), %v2013_v1  ;;  %vm307_vm2 = vcmask (!%p173_p2), 130048   ;;  %v1988_v30 = vld [vmem:[%s2560_s1 + $0x10] sm:$0xff] (!%p173_p2)   ;;  %v1989_v34 = vld [vmem:[%s2560_s1] sm:$0xff] (!%p173_p2)   ;;  %vm494_vm3 = vcmask (!%p173_p2), 1046528   ;;  %vm904_vm5 = vcmask (!%p173_p2), 1045504  }
   0x7   : > { %1771 = vmatpush3.bf16.msra.mxu0 (!%p173_p2), %v1982_v0  ;;  %1969 = vmatpush3.bf16.msra.mxu1 (!%p173_p2), %v1982_v0  ;;  %vm743_vm4 = vsmask.f32 (!%p173_p2), 6400  ;;  %vm1145_vm6 = vsmask.f32 (!%p173_p2), 5376  ;;  %vm1286_vm7 = vcmask (!%p173_p2), 1044480   ;;  %vm1499_vm8 = vcmask (!%p173_p2), 257024  }
   0x8   : > { %1772 = vmatprep.mubr.msk.bf16.mxu0 (!%p173_p2), %vm2014_vm0, %v2013_v1  ;;  %1784 = vmatprep.mubr.msk.bf16.mxu1 (!%p173_p2), %vm2014_vm0, %v2013_v1 }
   0x9   : > { %1814 = vmatprep.subr.bf16.mxu0 (!%p173_p2), %v2013_v1  ;;  %1792 = vmatprep.subr.bf16.mxu1 (!%p173_p2), %v2013_v1 }
   0xd   : > { %s2565_s16 = smov (!%p203_p3, %s1577_s16), 1 }
   0xe   : > { %s1970_s19 = smul.u32 56, %s2565_s16 }
   0xf   : > { %s1971_s13 = smul.u32 40, %s2565_s16 }
  0x10   : > { %s2065_s22 = scalar_lea.vmem %s2559_s0, %s1970_s19 }
  0x11   : > { %v219_v2 = vld [vmem:[%s2065_s22] sm:$0xf]  ;;  %v2069_v3 = vld [vmem:[%s2065_s22 + $0x4] sm:$0xf]  ;;  %v2072_v4 = vld [vmem:[%s2065_s22 + $0x8] sm:$0xf]  ;;  %s2501_s18 = scalar_lea.vmem %s2562_s3, %s1971_s13  ;;  %s2517_s23 = scalar_lea.vmem %s2563_s4, %s1971_s13 }
  0x12   : > { %v2075_v5 = vld [vmem:[%s2065_s22 + $0xc] sm:$0xf]  ;;  %v2078_v6 = vcombine.low %v219_v2, %v2069_v3  ;;  %v225_v7 = vld [vmem:[%s2065_s22 + $0x18] sm:$0xf]  ;;  %v226_v8 = vld [vmem:[%s2065_s22 + $0x1c] sm:$0xf] }
  0x13   : > { %v2084_v9 = vcombine.low %v2072_v4, %v2075_v5  ;;  %v227_v10 = vld [vmem:[%s2065_s22 + $0x20] sm:$0xf]  ;;  %v228_v11 = vld [vmem:[%s2065_s22 + $0x24] sm:$0xf]  ;;  %v2088_v12 = vcombine.low %v225_v7, %v226_v8  ;;  %v2091_v13 = vld [vmem:[%s2065_s22 + $0x10] sm:$0xf] }
  0x14   : > { %v258_v14 = vshrl.u32 %v2078_v6, 16  ;;  %v260_v15 = vshll.u32 %v2078_v6, 16  ;;  %v2095_v16 = vcombine.low %v227_v10, %v228_v11  ;;  %v224_v17 = vld [vmem:[%s2065_s22 + $0x14] sm:$0xf]  ;;  %v229_v18 = vld [vmem:[%s2065_s22 + $0x28] sm:$0xf]  ;;  %v2146_v50 = vcombine.low %v226_v8, %v227_v10 }
  0x15   : > { %v265_v19 = vshll.u32 %v2084_v9, 16  ;;  %v281_v20 = vshll.u32 %v2088_v12, 16  ;;  %v285_v21 = vshrl.u32 %v2088_v12, 16  ;;  %v2103_v22 = vcombine.low %v2091_v13, %v224_v17  ;;  %v230_v37 = vld [vmem:[%s2065_s22 + $0x2c] sm:$0xf] }
  0x16   : > { %v262_v23 = vrot.slane %v260_v15, 1  ;;  %v289_v24 = vshll.u32 %v2095_v16, 16  ;;  %v2106_v25 = vcombine.low %v229_v18, %v229_v18  ;;  %v269_v31 = vshrl.u32 %v2084_v9, 16 }
  0x17   : > { %v267_v26 = vrot.slane %v265_v19, 1  ;;  %v283_v27 = vrot.slane %v281_v20, 1  ;;  %v273_v32 = vshll.u32 %v2103_v22, 16  ;;  %v293_v35 = vshrl.u32 %v2095_v16, 16 }
  0x18   : > { %v263_v28 = vor.u32 %v262_v23, %v258_v14  ;;  %v291_v29 = vrot.slane %v289_v24, 1  ;;  %v297_v38 = vshll.u32 %v2106_v25, 16  ;;  %v2126_v39 = vcombine.low %v228_v11, %v229_v18  ;;  %v1994_v23 = vld [vmem:[%s2560_s1 + $0x18] sm:$0xff]  }
  0x19   : > { %v287_v33 = vor.u32 %v285_v21, %v283_v27  ;;  %v2130_v41 = vcombine.low %v229_v18, %v230_v37  ;;  %v271_v42 = vor.u32 %v269_v31, %v267_v26  ;;  %v275_v43 = vrot.slane %v273_v32, 1 }
  0x1a   : > { %v268_v36 = vsel %vm256_vm1, %v263_v28, %v267_v26  ;;  %v295_v44 = vor.u32 %v293_v35, %v291_v29  ;;  %v299_v45 = vrot.slane %v297_v38, 1  ;;  %v277_v47 = vshrl.u32 %v2103_v22, 16 }
  0x1b   : > { %1773 = vmatmul.mubr.msk.bf16.vlgmr.msra.gmra.mrb[0].mxu0 %vm307_vm2, %v268_v36  ;;  %v292_v40 = vsel %vm256_vm1, %v287_v33, %v291_v29  ;;  %v276_v46 = vsel %vm256_vm1, %v271_v42, %v275_v43  ;;  %v2143_v48 = vcombine.low %v224_v17, %v225_v7  ;;  %v2149_v52 = vrot.slane %v265_v19, 3 }
  0x1c   : > { %1785 = vmatmul.mubr.msk.bf16.vlgmr.msra.gmra.mrb[0].mxu1 %vm307_vm2, %v292_v40  ;;  %1815 = vmatpush3.bf16.msra.mxu0 %v1988_v30  ;;  %v300_v49 = vsel %vm256_vm1, %v295_v44, %v299_v45  ;;  %v630_v54 = vrot.slane %v2146_v50, 1  ;;  %v2154_v55 = vrot.slane %v269_v31, 2  ;;  %v279_v56 = vor.u32 %v277_v47, %v275_v43  ;;  %v2201_v45 = vld [vmem:[%s2065_s22 + $0x30] ss:$0 sps:$4 sm:$0xff]  }
  0x1d   : > { %1793 = vmatpush3.bf16.msra.mxu1 %v1989_v34  ;;  %1776 = vmatprep.mubr.msk.bf16.mxu0 %vm2014_vm0, %v2013_v1  ;;  %v762_v51 = vshrl.u32 %v2143_v48, 16  ;;  %v628_v53 = vrot.slane %v2143_v48, 1  ;;  %v765_v57 = vshll.u32 %v2143_v48, 16  ;;  %v632_v58 = vrot.slane %v2126_v39, 1 }
  0x1e   : > { %1788 = vmatprep.mubr.msk.bf16.mxu1 %vm2014_vm0, %v2013_v1  ;;  %1836 = vmatprep.subr.bf16.mxu1 %v2013_v1  ;;  %v1150_v59 = vrot.slane %v273_v32, 3  ;;  %v771_v62 = vshrl.u32 %v2146_v50, 16  ;;  %v774_v2 = vshll.u32 %v2146_v50, 16  ;;  %v1618_v7 = vcombine.low %v230_v37, %v230_v37 }
  0x1f   : > { %1858 = vmatprep.subr.bf16.mxu0 %v2013_v1  ;;  %v2166_v60 = vsel %vm494_vm3, %v628_v53, %v630_v54  ;;  %v764_v61 = vrot.slane %v762_v51, 1  ;;  %v767_v63 = vrot.slane %v765_v57, 2  ;;  %v2170_v0 = vsel %vm494_vm3, %v630_v54, %v632_v58 }
  0x20   : > { %v495_v8 = vrot.slane %v2078_v6, 1  ;;  %v773_v10 = vrot.slane %v771_v62, 1  ;;  %v780_v11 = vshrl.u32 %v2126_v39, 16  ;;  %v783_v14 = vshll.u32 %v2126_v39, 16 }
  0x21   : > { %v284_v15 = vsel %vm256_vm1, %v279_v56, %v283_v27  ;;  %v776_v17 = vrot.slane %v774_v2, 2  ;;  %v634_v18 = vrot.slane %v1618_v7, 1  ;;  %v789_v19 = vshrl.u32 %v1618_v7, 16 }
  0x22   : > { %v496_v26 = vrot.slane %v2084_v9, 1  ;;  %v782_v28 = vrot.slane %v780_v11, 1  ;;  %v785_v29 = vrot.slane %v783_v14, 2  ;;  %v792_v30 = vshll.u32 %v1618_v7, 16 }
  0x23   : > { %1777 = vmatmul.mubr.msk.bf16.gmra.mrb[4].mxu0 %vm307_vm2, %v276_v46  ;;  %v2181_v31 = vor.u32 %v767_v63, %v764_v61  ;;  %v777_v32 = vor.u32 %v776_v17, %v773_v10  ;;  %v2184_v33 = vsel %vm494_vm3, %v632_v58, %v634_v18  ;;  %v791_v27 = vrot.slane %v789_v19, 1  ;;  %v1995_v63 = vld [vmem:[%s2560_s1 + $0x20] sm:$0xff]  }
  0x24   : > { %1789 = vmatmul.mubr.msk.bf16.gmra.mrb[4].mxu1 %vm307_vm2, %v300_v49  ;;  %1780 = vmatprep.mubr.msk.bf16.mxu0 %vm2014_vm0, %v2013_v1  ;;  %v498_v34 = vrot.slane %v2103_v22, 1  ;;  %v786_v36 = vor.u32 %v785_v29, %v782_v28  ;;  %v794_v37 = vrot.slane %v792_v30, 2  ;;  %v908_v38 = vrot.slane %v2143_v48, 2 }
  0x25   : > { %1794 = vmatprep.mubr.msk.bf16.mxu1 %vm2014_vm0, %v2013_v1  ;;  %v2195_v40 = vsel %vm743_vm4, %v2181_v31, %v777_v32  ;;  %v1027_v42 = vrot.slane %v2084_v9, 2  ;;  %v1028_v43 = vrot.slane %v2103_v22, 2  ;;  %v910_v44 = vrot.slane %v2146_v50, 2 }
  0x26   : > { %v1149_v46 = vrot.slane %v277_v47, 2  ;;  %v795_v49 = vor.u32 %v794_v37, %v791_v27  ;;  %v1030_v51 = vrot.slane %v2088_v12, 2  ;;  %v497_v54 = vsel %vm494_vm3, %v495_v8, %v496_v26 }
  0x27   : > { %v2214_v50 = vsel %vm904_vm5, %v1027_v42, %v1028_v43  ;;  %v2219_v47 = vsel %vm904_vm5, %v908_v38, %v910_v44  ;;  %v912_v56 = vrot.slane %v2126_v39, 2  ;;  %v1032_v61 = vrot.slane %v2095_v16, 2 }
  0x28   : > { %v2223_v57 = vsel %vm743_vm4, %v786_v36, %v795_v49  ;;  %v2226_v58 = vsel %vm904_vm5, %v1028_v43, %v1030_v51  ;;  %v914_v62 = vrot.slane %v1618_v7, 2  ;;  %v1034_v8 = vrot.slane %v2130_v41, 2 }
  0x29   : > { %v2233_v2 = vsel %vm904_vm5, %v910_v44, %v912_v56  ;;  %v1036_v39 = vrot.slane %v2201_v45, 2  ;;  %v2238_v10 = vsel %vm904_vm5, %v1030_v51, %v1032_v61  ;;  %v1148_v7 = vor.u32 %v2149_v52, %v2154_v55 }
  0x2a   : > { %v2241_v11 = vsel %vm904_vm5, %v912_v56, %v914_v62  ;;  %v1151_v14 = vor.u32 %v1150_v59, %v1149_v46  ;;  %v1153_v18 = vrot.slane %v285_v21, 2  ;;  %v1154_v19 = vrot.slane %v281_v20, 3 }
  0x2b   : > { %1781 = vmatmul.mubr.msk.bf16.gmra.mrb[8].mxu0 %vm307_vm2, %v284_v15  ;;  %v2246_v15 = vsel %vm904_vm5, %v1032_v61, %v1034_v8  ;;  %v2249_v17 = vsel %vm904_vm5, %v1034_v8, %v1036_v39  ;;  %v1287_v52 = vrot.slane %v2084_v9, 3  ;;  %v1288_v55 = vrot.slane %v2103_v22, 3 }
  0x2c   : > { %1795 = vmatmul.mubr.msk.bf16.vlgmr.msra.gmra.mrb[8].mxu1 %vm307_vm2, %v2078_v6  ;;  %1816 = vmatprep.mubr.msk.bf16.mxu0 %vm2014_vm0, %v2013_v1  ;;  %v2206_v6 = vsel %vm743_vm4, %v777_v32, %v786_v36  ;;  %v1155_v59 = vor.u32 %v1154_v19, %v1153_v18  ;;  %v1157_v21 = vrot.slane %v293_v35, 2  ;;  %v1158_v20 = vrot.slane %v289_v24, 3 }
  0x2d   : > { %1837 = vmatpush3.bf16.msra.mxu1 %v1994_v23  ;;  %1798 = vmatprep.mubr.msk.bf16.mxu1 %vm2014_vm0, %v2013_v1  ;;  %v2257_v23 = vsel %vm1145_vm6, %v1148_v7, %v1151_v14  ;;  %v1290_v28 = vrot.slane %v2088_v12, 3  ;;  %v2273_v29 = vsel %vm1286_vm7, %v1287_v52, %v1288_v55  ;;  %v1162_v30 = vshrl.u32 %v2130_v41, 16 }
  0x2e   : > { %1880 = vmatprep.subr.bf16.mxu1 %v2013_v1  ;;  %v1165_v32 = vshll.u32 %v2130_v41, 16  ;;  %v2279_v35 = vsel %vm1145_vm6, %v1151_v14, %v1155_v59  ;;  %v1159_v24 = vor.u32 %v1158_v20, %v1157_v21  ;;  %v499_v42 = vsel %vm494_vm3, %v496_v26, %v498_v34 }
  0x2f   : > { %v2282_v27 = vsel %vm1286_vm7, %v1288_v55, %v1290_v28  ;;  %v1164_v36 = vrot.slane %v1162_v30, 2  ;;  %v1292_v46 = vrot.slane %v2095_v16, 3  ;;  %v1171_v26 = vshrl.u32 %v2201_v45, 16 }
  0x30   : > { %v1167_v37 = vrot.slane %v1165_v32, 3  ;;  %v2290_v43 = vsel %vm1145_vm6, %v1155_v59, %v1159_v24  ;;  %v1294_v8 = vrot.slane %v2130_v41, 3  ;;  %v1613_v18 = vcombine.low %v2069_v3, %v2072_v4 }
  0x31   : > { %v2298_v51 = vsel %vm1286_vm7, %v1290_v28, %v1292_v46  ;;  %v1173_v56 = vrot.slane %v1171_v26, 2  ;;  %v504_v19 = vrot.slane %v2106_v25, 1  ;;  %v1997_v28 = vld [vmem:[%s2560_s1 + $0x28] sm:$0xff]  }
  0x32   : > { %v1168_v44 = vor.u32 %v1167_v37, %v1164_v36  ;;  %v2318_v7 = vsel %vm1286_vm7, %v1292_v46, %v1294_v8  ;;  %v748_v52 = vshll.u32 %v1613_v18, 16  ;;  %v625_v3 = vrot.slane %v1613_v18, 1  ;;  %v1999_v36 = vld [vmem:[%s2560_s1 + $0x30] sm:$0xff]  }
  0x33   : > { %1817 = vmatmul.mubr.msk.bf16.vlgmr.msra.gmra.mrb[12].mxu0 %vm307_vm2, %v497_v54  ;;  %v1174_v54 = vshll.u32 %v2201_v45, 16 }
  0x34   : > { %1799 = vmatmul.mubr.msk.bf16.gmra.mrb[12].mxu1 %vm307_vm2, %v2084_v9  ;;  %1859 = vmatpush3.bf16.msra.mxu0 %v1995_v63  ;;  %v2295_v49 = vsel %vm1145_vm6, %v1159_v24, %v1168_v44  ;;  %v500_v9 = vrot.slane %v2088_v12, 1  ;;  %v750_v21 = vrot.slane %v748_v52, 2 }
  0x35   : > { %1802 = vmatprep.mubr.msk.bf16.mxu1 %vm2014_vm0, %v2013_v1  ;;  %1820 = vmatprep.mubr.msk.bf16.mxu0 %vm2014_vm0, %v2013_v1  ;;  %v1176_v61 = vrot.slane %v1174_v54, 3 }
  0x36   : > { %1902 = vmatprep.subr.bf16.mxu0 %v2013_v1  ;;  %v501_v62 = vsel %vm494_vm3, %v498_v34, %v500_v9  ;;  %v1296_v34 = vrot.slane %v2201_v45, 3  ;;  %v745_v45 = vshrl.u32 %v1613_v18, 16 }
  0x37   : > { %v1177_v63 = vor.u32 %v1176_v61, %v1173_v56 }
  0x38   : > { %v2329_v41 = vsel %vm1286_vm7, %v1294_v8, %v1296_v34 }
  0x39   : > { %v2315_v39 = vsel %vm1145_vm6, %v1168_v44, %v1177_v63 }
  0x3b   : > { %1821 = vmatmul.mubr.msk.bf16.gmra.mrb[16].mxu0 %vm307_vm2, %v499_v42 }
  0x3c   : > { %1803 = vmatmul.mubr.msk.bf16.gmra.mrb[16].mxu1 %vm307_vm2, %v2103_v22  ;;  %1824 = vmatprep.mubr.msk.bf16.mxu0 %vm2014_vm0, %v2013_v1  ;;  %v502_v22 = vrot.slane %v2095_v16, 1 }
  0x3d   : > { %1806 = vmatprep.mubr.msk.bf16.mxu1 %vm2014_vm0, %v2013_v1 }
  0x3e   : > { %v503_v14 = vsel %vm494_vm3, %v500_v9, %v502_v22 }
  0x43   : > { %1825 = vmatmul.mubr.msk.bf16.gmra.mrb[20].mxu0 %vm307_vm2, %v501_v62 }
  0x44   : > { %1807 = vmatmul.mubr.msk.bf16.gmra.mrb[20].mxu1 %vm307_vm2, %v2088_v12  ;;  %1828 = vmatprep.mubr.msk.bf16.mxu0 %vm2014_vm0, %v2013_v1  ;;  %v1614_v12 = vcombine.low %v2075_v5, %v2091_v13  ;;  %v505_v5 = vsel %vm494_vm3, %v502_v22, %v504_v19  ;;  %v747_v13 = vrot.slane %v745_v45, 1 }
  0x45   : > { %1810 = vmatprep.mubr.msk.bf16.mxu1 %vm2014_vm0, %v2013_v1 }
  0x46   : > { %v753_v55 = vshrl.u32 %v1614_v12, 16  ;;  %v756_v59 = vshll.u32 %v1614_v12, 16  ;;  %v626_v4 = vrot.slane %v1614_v12, 1  ;;  %v751_v30 = vor.u32 %v750_v21, %v747_v13 }
  0x48   : > { %v755_v25 = vrot.slane %v753_v55, 1  ;;  %v758_v20 = vrot.slane %v756_v59, 2  ;;  %v629_v37 = vsel %vm494_vm3, %v626_v4, %v628_v53  ;;  %v905_v53 = vrot.slane %v1613_v18, 2 }
  0x4a   : > { %v759_v32 = vor.u32 %v758_v20, %v755_v25 }
  0x4b   : > { %1829 = vmatmul.mubr.msk.bf16.gmra.mrb[24].mxu0 %vm307_vm2, %v503_v14 }
  0x4c   : > { %1811 = vmatmul.mubr.msk.bf16.gmra.mrb[24].mxu1 %vm307_vm2, %v2095_v16  ;;  %1832 = vmatprep.mubr.msk.bf16.mxu0 %vm2014_vm0, %v2013_v1  ;;  %v627_v16 = vsel %vm494_vm3, %v625_v3, %v626_v4  ;;  %v760_v24 = vsel %vm743_vm4, %v751_v30, %v759_v32  ;;  %v769_v42 = vsel %vm743_vm4, %v759_v32, %v2181_v31  ;;  %v2002_v31 = vld [vmem:[%s2560_s1 + $0x38] sm:$0xff]  }
  0x4d   : > { %1838 = vmatprep.mubr.msk.bf16.mxu1 %vm2014_vm0, %v2013_v1 }
  0x53   : > { %1833 = vmatmul.mubr.msk.bf16.gmra.mrb[28].mxu0 %vm307_vm2, %v505_v5 }
  0x54   : > { %1839 = vmatmul.mubr.msk.bf16.vlgmr.msra.gmra.mrb[28].mxu1 %vm307_vm2, %v627_v16  ;;  %1860 = vmatprep.mubr.msk.bf16.mxu0 %vm2014_vm0, %v2013_v1 }
  0x55   : > { %1881 = vmatpush3.bf16.msra.mxu1 %v1997_v28  ;;  %1842 = vmatprep.mubr.msk.bf16.mxu1 %vm2014_vm0, %v2013_v1 }
  0x56   : > { %1924 = vmatprep.subr.bf16.mxu1 %v2013_v1 }
  0x5b   : > { %1861 = vmatmul.mubr.msk.bf16.vlgmr.msra.gmra.mrb[32].mxu0 %vm307_vm2, %v760_v24 }
  0x5c   : > { %1843 = vmatmul.mubr.msk.bf16.gmra.mrb[32].mxu1 %vm307_vm2, %v629_v37  ;;  %1903 = vmatpush3.bf16.msra.mxu0 %v1999_v36 }
  0x5d   : > { %1846 = vmatprep.mubr.msk.bf16.mxu1 %vm2014_vm0, %v2013_v1  ;;  %1864 = vmatprep.mubr.msk.bf16.mxu0 %vm2014_vm0, %v2013_v1 }
  0x5e   : > { %1946 = vmatprep.subr.bf16.mxu0 %v2013_v1 }
  0x63   : > { %1865 = vmatmul.mubr.msk.bf16.gmra.mrb[36].mxu0 %vm307_vm2, %v769_v42 }
  0x64   : > { %1847 = vmatmul.mubr.msk.bf16.gmra.mrb[36].mxu1 %vm307_vm2, %v2166_v60  ;;  %1868 = vmatprep.mubr.msk.bf16.mxu0 %vm2014_vm0, %v2013_v1  ;;  %v906_v60 = vrot.slane %v1614_v12, 2 }
  0x65   : > { %1850 = vmatprep.mubr.msk.bf16.mxu1 %vm2014_vm0, %v2013_v1 }
  0x6b   : > { %1869 = vmatmul.mubr.msk.bf16.gmra.mrb[40].mxu0 %vm307_vm2, %v2195_v40  ;;  %v909_v40 = vsel %vm904_vm5, %v906_v60, %v908_v38 }
  0x6c   : > { %1851 = vmatmul.mubr.msk.bf16.gmra.mrb[40].mxu1 %vm307_vm2, %v2170_v0  ;;  %1872 = vmatprep.mubr.msk.bf16.mxu0 %vm2014_vm0, %v2013_v1  ;;  %v907_v0 = vsel %vm904_vm5, %v905_v53, %v906_v60 }
  0x6d   : > { %1854 = vmatprep.mubr.msk.bf16.mxu1 %vm2014_vm0, %v2013_v1 }
  0x73   : > { %1873 = vmatmul.mubr.msk.bf16.gmra.mrb[44].mxu0 %vm307_vm2, %v2206_v6 }
  0x74   : > { %1855 = vmatmul.mubr.msk.bf16.gmra.mrb[44].mxu1 %vm307_vm2, %v2184_v33  ;;  %1876 = vmatprep.mubr.msk.bf16.mxu0 %vm2014_vm0, %v2013_v1  ;;  %v2003_v33 = vld [vmem:[%s2560_s1 + $0x40] sm:$0xff]  }
  0x75   : > { %1882 = vmatprep.mubr.msk.bf16.mxu1 %vm2014_vm0, %v2013_v1 }
  0x7b   : > { %1877 = vmatmul.mubr.msk.bf16.gmra.mrb[48].mxu0 %vm307_vm2, %v2223_v57 }
  0x7c   : > { %1883 = vmatmul.mubr.msk.bf16.vlgmr.msra.gmra.mrb[48].mxu1 %vm307_vm2, %v907_v0  ;;  %1904 = vmatprep.mubr.msk.bf16.mxu0 %vm2014_vm0, %v2013_v1 }
  0x7d   : > { %1925 = vmatpush3.bf16.msra.mxu1 %v2002_v31  ;;  %1886 = vmatprep.mubr.msk.bf16.mxu1 %vm2014_vm0, %v2013_v1 }
  0x83   : > { %1905 = vmatmul.mubr.msk.bf16.vlgmr.msra.gmra.mrb[52].mxu0 %vm307_vm2, %v2214_v50 }
  0x84   : > { %1887 = vmatmul.mubr.msk.bf16.gmra.mrb[52].mxu1 %vm307_vm2, %v909_v40  ;;  %1947 = vmatpush3.bf16.msra.mxu0 %v2003_v33 }
  0x85   : > { %1890 = vmatprep.mubr.msk.bf16.mxu1 %vm2014_vm0, %v2013_v1  ;;  %1908 = vmatprep.mubr.msk.bf16.mxu0 %vm2014_vm0, %v2013_v1 }
  0x8b   : > { %1909 = vmatmul.mubr.msk.bf16.gmra.mrb[56].mxu0 %vm307_vm2, %v2226_v58 }
  0x8c   : > { %1891 = vmatmul.mubr.msk.bf16.gmra.mrb[56].mxu1 %vm307_vm2, %v2219_v47  ;;  %1912 = vmatprep.mubr.msk.bf16.mxu0 %vm2014_vm0, %v2013_v1 }
  0x8d   : > { %1894 = vmatprep.mubr.msk.bf16.mxu1 %vm2014_vm0, %v2013_v1 }
  0x93   : > { %1913 = vmatmul.mubr.msk.bf16.gmra.mrb[60].mxu0 %vm307_vm2, %v2238_v10 }
  0x94   : > { %1895 = vmatmul.mubr.msk.bf16.gmra.mrb[60].mxu1 %vm307_vm2, %v2233_v2  ;;  %1916 = vmatprep.mubr.msk.bf16.mxu0 %vm2014_vm0, %v2013_v1 }
  0x95   : > { %1898 = vmatprep.mubr.msk.bf16.mxu1 %vm2014_vm0, %v2013_v1 }
  0x9b   : > { %1917 = vmatmul.mubr.msk.bf16.gmra.mrb[64].mxu0 %vm307_vm2, %v2246_v15 }
  0x9c   : > { %1899 = vmatmul.mubr.msk.bf16.gmra.mrb[64].mxu1 %vm307_vm2, %v2241_v11  ;;  %1920 = vmatprep.mubr.msk.bf16.mxu0 %vm2014_vm0, %v2013_v1 }
  0x9d   : > { %1926 = vmatprep.mubr.msk.bf16.mxu1 %vm2014_vm0, %v2013_v1 }
  0xa3   : > { %1921 = vmatmul.mubr.msk.bf16.gmra.mrb[68].mxu0 %vm307_vm2, %v2249_v17 }
  0xa4   : > { %1927 = vmatmul.mubr.msk.bf16.vlgmr.msra.gmra.mrb[68].mxu1 %vm307_vm2, %v2257_v23  ;;  %1948 = vmatprep.mubr.msk.bf16.mxu0 %vm2014_vm0, %v2013_v1 }
  0xa5   : > { %1930 = vmatprep.mubr.msk.bf16.mxu1 %vm2014_vm0, %v2013_v1 }
  0xab   : > { %1949 = vmatmul.mubr.msk.bf16.vlgmr.msra.gmra.mrb[72].mxu0 %vm307_vm2, %v2273_v29 }
  0xac   : > { %1931 = vmatmul.mubr.msk.bf16.gmra.mrb[72].mxu1 %vm307_vm2, %v2279_v35  ;;  %1952 = vmatprep.mubr.msk.bf16.mxu0 %vm2014_vm0, %v2013_v1 }
  0xad   : > { %1934 = vmatprep.mubr.msk.bf16.mxu1 %vm2014_vm0, %v2013_v1 }
  0xb3   : > { %1953 = vmatmul.mubr.msk.bf16.gmra.mrb[76].mxu0 %vm307_vm2, %v2282_v27 }
  0xb4   : > { %1935 = vmatmul.mubr.msk.bf16.gmra.mrb[76].mxu1 %vm307_vm2, %v2290_v43  ;;  %1956 = vmatprep.mubr.msk.bf16.mxu0 %vm2014_vm0, %v2013_v1 }
  0xb5   : > { %1938 = vmatprep.mubr.msk.bf16.mxu1 %vm2014_vm0, %v2013_v1 }
  0xbb   : > { %1957 = vmatmul.mubr.msk.bf16.gmra.mrb[80].mxu0 %vm307_vm2, %v2298_v51 }
  0xbc   : > { %1939 = vmatmul.mubr.msk.bf16.gmra.mrb[80].mxu1 %vm307_vm2, %v2295_v49  ;;  %1960 = vmatprep.mubr.msk.bf16.mxu0 %vm2014_vm0, %v2013_v1 }
  0xbd   : > { %1942 = vmatprep.mubr.msk.bf16.mxu1 %vm2014_vm0, %v2013_v1 }
  0xc3   : > { %1961 = vmatmul.mubr.msk.bf16.gmra.mrb[84].mxu0 %vm307_vm2, %v2318_v7 }
  0xc4   : > { %1943 = vmatmul.mubr.msk.bf16.gmra.mrb[84].mxu1 %vm307_vm2, %v2315_v39  ;;  %1964 = vmatprep.mubr.msk.bf16.mxu0 %vm2014_vm0, %v2013_v1 }
  0xcb   : > { %1965 = vmatmul.mubr.msk.bf16.gmra.mrb[88].mxu0 %vm307_vm2, %v2329_v41 }
  0xee   : > { %v357_v48 = vpop.f32.mrb[0].mxu0 }
  0xef   : > { %v1774_v38 = vpop.f32.mrb[1].mxu0  ;;  %v381_v6 = vpop.f32.mrb[0].mxu1 }
  0xf0   : > { %v360_v50 = vpop.f32.mrb[2].mxu0  ;;  %v1786_v47 = vpop.f32.mrb[1].mxu1 }
  0xf1   : > { %v1775_v57 = vpop.f32.mrb[3].mxu0  ;;  %v384_v58 = vpop.f32.mrb[2].mxu1 }
  0xf2   : > { %v1787_v2 = vpop.f32.mrb[3].mxu1 }
  0xf6   : > { %v365_v10 = vpop.f32.mrb[4].mxu0 }
  0xf7   : > { %v1778_v11 = vpop.f32.mrb[5].mxu0  ;;  %v389_v15 = vpop.f32.mrb[4].mxu1 }
  0xf8   : > { %v368_v17 = vpop.f32.mrb[6].mxu0  ;;  %v1790_v23 = vpop.f32.mrb[5].mxu1 }
  0xf9   : > { %v1779_v29 = vpop.f32.mrb[7].mxu0  ;;  %v392_v35 = vpop.f32.mrb[6].mxu1 }
  0xfa   : > { %v1791_v27 = vpop.f32.mrb[7].mxu1 }
  0xfe   : > { %v373_v1 = vpop.f32.mrb[8].mxu0 }
  0xff   : > { %v446_v43 = vpop.f32.mrb[8].mxu1  ;;  %v1782_v44 = vpop.f32.mrb[9].mxu0 }
 0x100   : > { %v447_v46 = vadd.f32 %v446_v43, %v357_v48  ;;  %v1796_v49 = vpop.f32.mrb[9].mxu1  ;;  %v376_v51 = vpop.f32.mrb[10].mxu0 }
 0x101   : > { %v449_v9 = vpop.f32.mrb[10].mxu1  ;;  %v1783_v26 = vpop.f32.mrb[11].mxu0 }
 0x102   : > { %v450_v54 = vadd.f32 %v449_v9, %v360_v50  ;;  %v1797_v56 = vpop.f32.mrb[11].mxu1 }
 0x106   : > { %v561_v61 = vpop.f32.mrb[12].mxu0 }
 0x107   : > { %v454_v62 = vpop.f32.mrb[12].mxu1  ;;  %v600_v63 = vadd.f32 %v561_v61, %v447_v46  ;;  %v1818_v8 = vpop.f32.mrb[13].mxu0 }
 0x108   : > { %v455_v39 = vadd.f32 %v454_v62, %v365_v10  ;;  %v1800_v7 = vpop.f32.mrb[13].mxu1  ;;  %v564_v22 = vpop.f32.mrb[14].mxu0 }
 0x109   : > { %v457_v34 = vpop.f32.mrb[14].mxu1  ;;  %v601_v41 = vadd.f32 %v564_v22, %v450_v54  ;;  %v1819_v14 = vpop.f32.mrb[15].mxu0 }
 0x10a   : > { %v458_v18 = vadd.f32 %v457_v34, %v368_v17  ;;  %v1801_v12 = vpop.f32.mrb[15].mxu1 }
 0x10e   : > { %v569_v19 = vpop.f32.mrb[16].mxu0 }
 0x10f   : > { %v462_v45 = vpop.f32.mrb[16].mxu1  ;;  %v602_v52 = vadd.f32 %v569_v19, %v455_v39  ;;  %v1822_v55 = vpop.f32.mrb[17].mxu0 }
 0x110   : > { %v463_v59 = vadd.f32 %v462_v45, %v373_v1  ;;  %v1804_v3 = vpop.f32.mrb[17].mxu1  ;;  %v572_v4 = vpop.f32.mrb[18].mxu0 }
 0x111   : > { %v465_v5 = vpop.f32.mrb[18].mxu1  ;;  %v603_v13 = vadd.f32 %v572_v4, %v458_v18  ;;  %v1823_v21 = vpop.f32.mrb[19].mxu0 }
 0x112   : > { %v466_v25 = vadd.f32 %v465_v5, %v376_v51  ;;  %v1805_v20 = vpop.f32.mrb[19].mxu1 }
 0x116   : > { %v577_v16 = vpop.f32.mrb[20].mxu0 }
 0x117   : > { %v470_v28 = vpop.f32.mrb[20].mxu1  ;;  %v604_v30 = vadd.f32 %v577_v16, %v463_v59  ;;  %v1826_v32 = vpop.f32.mrb[21].mxu0 }
 0x118   : > { %v471_v24 = vadd.f32 %v470_v28, %v381_v6  ;;  %v1808_v36 = vpop.f32.mrb[21].mxu1  ;;  %v580_v37 = vpop.f32.mrb[22].mxu0 }
 0x119   : > { %v473_v42 = vpop.f32.mrb[22].mxu1  ;;  %v605_v53 = vadd.f32 %v580_v37, %v466_v25  ;;  %v1827_v60 = vpop.f32.mrb[23].mxu0 }
 0x11a   : > { %v474_v0 = vadd.f32 %v473_v42, %v384_v58  ;;  %v1809_v31 = vpop.f32.mrb[23].mxu1 }
 0x11e   : > { %v585_v33 = vpop.f32.mrb[24].mxu0 }
 0x11f   : > { %v478_v40 = vpop.f32.mrb[24].mxu1  ;;  %v606_v48 = vadd.f32 %v585_v33, %v471_v24  ;;  %v1830_v38 = vpop.f32.mrb[25].mxu0 }
 0x120   : > { %v479_v50 = vadd.f32 %v478_v40, %v389_v15  ;;  %v1812_v47 = vpop.f32.mrb[25].mxu1  ;;  %v588_v57 = vpop.f32.mrb[26].mxu0 }
 0x121   : > { %v481_v2 = vpop.f32.mrb[26].mxu1  ;;  %v607_v10 = vadd.f32 %v588_v57, %v474_v0  ;;  %v1831_v11 = vpop.f32.mrb[27].mxu0 }
 0x122   : > { %v482_v17 = vadd.f32 %v481_v2, %v392_v35  ;;  %v1813_v23 = vpop.f32.mrb[27].mxu1 }
 0x126   : > { %v593_v6 = vpop.f32.mrb[28].mxu0 }
 0x127   : > { %v608_v29 = vadd.f32 %v593_v6, %v479_v50  ;;  %v691_v27 = vpop.f32.mrb[28].mxu1  ;;  %v1834_v1 = vpop.f32.mrb[29].mxu0 }
 0x128   : > { %v730_v43 = vadd.f32 %v691_v27, %v600_v63  ;;  %v1840_v44 = vpop.f32.mrb[29].mxu1  ;;  %v596_v58 = vpop.f32.mrb[30].mxu0 }
 0x129   : > { %v609_v46 = vadd.f32 %v596_v58, %v482_v17  ;;  %v694_v49 = vpop.f32.mrb[30].mxu1  ;;  %v1835_v51 = vpop.f32.mrb[31].mxu0 }
 0x12a   : > { %v731_v9 = vadd.f32 %v694_v49, %v601_v41  ;;  %v1841_v26 = vpop.f32.mrb[31].mxu1 }
 0x12e   : > { %v852_v15 = vpop.f32.mrb[32].mxu0 }
 0x12f   : > { %v699_v54 = vpop.f32.mrb[32].mxu1  ;;  %v891_v56 = vadd.f32 %v852_v15, %v730_v43  ;;  %v1862_v61 = vpop.f32.mrb[33].mxu0 }
 0x130   : > { %v732_v62 = vadd.f32 %v699_v54, %v602_v52  ;;  %v1844_v8 = vpop.f32.mrb[33].mxu1  ;;  %v855_v35 = vpop.f32.mrb[34].mxu0 }
 0x131   : > { %v702_v39 = vpop.f32.mrb[34].mxu1  ;;  %v892_v7 = vadd.f32 %v855_v35, %v731_v9  ;;  %v1863_v22 = vpop.f32.mrb[35].mxu0 }
 0x132   : > { %v733_v34 = vadd.f32 %v702_v39, %v603_v13  ;;  %v1845_v14 = vpop.f32.mrb[35].mxu1 }
 0x136   : > { %v860_v63 = vpop.f32.mrb[36].mxu0 }
 0x137   : > { %v707_v18 = vpop.f32.mrb[36].mxu1  ;;  %v893_v12 = vadd.f32 %v860_v63, %v732_v62  ;;  %v1866_v19 = vpop.f32.mrb[37].mxu0 }
 0x138   : > { %v734_v45 = vadd.f32 %v707_v18, %v604_v30  ;;  %v1848_v55 = vpop.f32.mrb[37].mxu1  ;;  %v863_v41 = vpop.f32.mrb[38].mxu0 }
 0x139   : > { %v710_v59 = vpop.f32.mrb[38].mxu1  ;;  %v894_v3 = vadd.f32 %v863_v41, %v733_v34  ;;  %v1867_v4 = vpop.f32.mrb[39].mxu0 }
 0x13a   : > { %v735_v5 = vadd.f32 %v710_v59, %v605_v53  ;;  %v1849_v21 = vpop.f32.mrb[39].mxu1 }
 0x13e   : > { %v868_v52 = vpop.f32.mrb[40].mxu0 }
 0x13f   : > { %v715_v25 = vpop.f32.mrb[40].mxu1  ;;  %v895_v20 = vadd.f32 %v868_v52, %v734_v45  ;;  %v1870_v16 = vpop.f32.mrb[41].mxu0 }
 0x140   : > { %v736_v28 = vadd.f32 %v715_v25, %v606_v48  ;;  %v1852_v32 = vpop.f32.mrb[41].mxu1  ;;  %v871_v13 = vpop.f32.mrb[42].mxu0 }
 0x141   : > { %v718_v24 = vpop.f32.mrb[42].mxu1  ;;  %v896_v36 = vadd.f32 %v871_v13, %v735_v5  ;;  %v1871_v37 = vpop.f32.mrb[43].mxu0 }
 0x142   : > { %v737_v42 = vadd.f32 %v718_v24, %v607_v10  ;;  %v1853_v60 = vpop.f32.mrb[43].mxu1 }
 0x146   : > { %v876_v30 = vpop.f32.mrb[44].mxu0 }
 0x147   : > { %v723_v0 = vpop.f32.mrb[44].mxu1  ;;  %v897_v31 = vadd.f32 %v876_v30, %v736_v28  ;;  %v1874_v33 = vpop.f32.mrb[45].mxu0 }
 0x148   : > { %v738_v40 = vadd.f32 %v723_v0, %v608_v29  ;;  %v1856_v38 = vpop.f32.mrb[45].mxu1  ;;  %v879_v53 = vpop.f32.mrb[46].mxu0 }
 0x149   : > { %v726_v50 = vpop.f32.mrb[46].mxu1  ;;  %v898_v47 = vadd.f32 %v879_v53, %v737_v42  ;;  %v1875_v57 = vpop.f32.mrb[47].mxu0 }
 0x14a   : > { %v739_v2 = vadd.f32 %v726_v50, %v609_v46  ;;  %v1857_v11 = vpop.f32.mrb[47].mxu1 }
 0x14e   : > { %v884_v48 = vpop.f32.mrb[48].mxu0 }
 0x14f   : > { %v899_v17 = vadd.f32 %v884_v48, %v738_v40  ;;  %v971_v23 = vpop.f32.mrb[48].mxu1  ;;  %v1878_v6 = vpop.f32.mrb[49].mxu0 }
 0x150   : > { %v1010_v27 = vadd.f32 %v971_v23, %v891_v56  ;;  %v1884_v1 = vpop.f32.mrb[49].mxu1  ;;  %v887_v10 = vpop.f32.mrb[50].mxu0 }
 0x151   : > { %v900_v43 = vadd.f32 %v887_v10, %v739_v2  ;;  %v974_v44 = vpop.f32.mrb[50].mxu1  ;;  %v1879_v58 = vpop.f32.mrb[51].mxu0 }
 0x152   : > { %v1011_v49 = vadd.f32 %v974_v44, %v892_v7  ;;  %v1885_v51 = vpop.f32.mrb[51].mxu1  ;;  %v1693_v44 = vld [vmem:[%s2501_s18] sm:$0xff]  }
 0x156   : > { %v1093_v29 = vpop.f32.mrb[52].mxu0 }
 0x157   : > { %v979_v9 = vpop.f32.mrb[52].mxu1  ;;  %v1132_v26 = vadd.f32 %v1093_v29, %v1010_v27  ;;  %v1906_v15 = vpop.f32.mrb[53].mxu0 }
 0x158   : > { %v1012_v54 = vadd.f32 %v979_v9, %v893_v12  ;;  %v1888_v61 = vpop.f32.mrb[53].mxu1  ;;  %v1096_v46 = vpop.f32.mrb[54].mxu0  ;;  %v1694_v9 = vunpack.c.l.bf16 %v1693_v44 }
 0x159   : > { %v982_v62 = vpop.f32.mrb[54].mxu1  ;;  %v1133_v8 = vadd.f32 %v1096_v46, %v1011_v49  ;;  %v1907_v35 = vpop.f32.mrb[55].mxu0  ;;  %v2507_v49 = vld [vmem:[%s2561_s2] ss:$0 sm:$0xff] }
 0x15a   : > { %v1013_v39 = vadd.f32 %v982_v62, %v894_v3  ;;  %v1889_v22 = vpop.f32.mrb[55].mxu1  ;;  %v1695_v35 = vunpack.c.h.bf16 %v1693_v44 }
 0x15e   : > { %v1101_v56 = vpop.f32.mrb[56].mxu0 }
 0x15f   : > { %v987_v34 = vpop.f32.mrb[56].mxu1  ;;  %v1134_v14 = vadd.f32 %v1101_v56, %v1012_v54  ;;  %v1910_v63 = vpop.f32.mrb[57].mxu0 }
 0x160   : > { %v1014_v18 = vadd.f32 %v987_v34, %v895_v20  ;;  %v1892_v19 = vpop.f32.mrb[57].mxu1  ;;  %v1104_v7 = vpop.f32.mrb[58].mxu0 }
 0x161   : > { %v990_v45 = vpop.f32.mrb[58].mxu1  ;;  %v1135_v55 = vadd.f32 %v1104_v7, %v1013_v39  ;;  %v1911_v41 = vpop.f32.mrb[59].mxu0 }
 0x162   : > { %v1015_v59 = vadd.f32 %v990_v45, %v896_v36  ;;  %v1893_v4 = vpop.f32.mrb[59].mxu1 }
 0x166   : > { %v1109_v12 = vpop.f32.mrb[60].mxu0 }
 0x167   : > { %v995_v5 = vpop.f32.mrb[60].mxu1  ;;  %v2483_v21 = vadd.f32 %v1109_v12, %v1014_v18  ;;  %v1914_v52 = vpop.f32.mrb[61].mxu0  ;;  %v1712_v18 = vld [vmem:[%s2501_s18 + $0x8] sm:$0xff]  }
 0x168   : > { %v1016_v25 = vadd.f32 %v995_v5, %v897_v31  ;;  %v1896_v3 = vpop.f32.mrb[61].mxu1  ;;  %v1112_v16 = vpop.f32.mrb[62].mxu0  ;;  %v1698_v4 = vunpack.c.l.bf16 %v1712_v18 }
 0x169   : > { %v998_v28 = vpop.f32.mrb[62].mxu1  ;;  %v2485_v32 = vadd.f32 %v1112_v16, %v1015_v59  ;;  %v1915_v20 = vpop.f32.mrb[63].mxu0 }
 0x16a   : > { %v1017_v13 = vadd.f32 %v998_v28, %v898_v47  ;;  %v1897_v24 = vpop.f32.mrb[63].mxu1 }
 0x16e   : > { %v1117_v37 = vpop.f32.mrb[64].mxu0 }
 0x16f   : > { %v1003_v42 = vpop.f32.mrb[64].mxu1  ;;  %v2487_v60 = vadd.f32 %v1117_v37, %v1016_v25  ;;  %v1918_v36 = vpop.f32.mrb[65].mxu0 }
 0x170   : > { %v1018_v30 = vadd.f32 %v1003_v42, %v899_v17  ;;  %v1900_v0 = vpop.f32.mrb[65].mxu1  ;;  %v1120_v33 = vpop.f32.mrb[66].mxu0 }
 0x171   : > { %v1006_v40 = vpop.f32.mrb[66].mxu1  ;;  %v2489_v31 = vadd.f32 %v1120_v33, %v1017_v13  ;;  %v1919_v38 = vpop.f32.mrb[67].mxu0  ;;  %v1699_v13 = vunpack.c.h.bf16 %v1712_v18 }
 0x172   : > { %v1019_v53 = vadd.f32 %v1006_v40, %v900_v43  ;;  %v1901_v50 = vpop.f32.mrb[67].mxu1 }
 0x176   : > { %v1125_v57 = vpop.f32.mrb[68].mxu0 }
 0x177   : > { %v2492_v2 = vadd.f32 %v1125_v57, %v1018_v30  ;;  %v1234_v47 = vpop.f32.mrb[68].mxu1  ;;  %v1922_v11 = vpop.f32.mrb[69].mxu0  ;;  %v1713_v30 = vld [vmem:[%s2501_s18 + $0x10] sm:$0xff]  }
 0x178   : > { %v1273_v48 = vadd.f32 %v1234_v47, %v1132_v26  ;;  %v1928_v23 = vpop.f32.mrb[69].mxu1  ;;  %v1128_v6 = vpop.f32.mrb[70].mxu0  ;;  %v1702_v47 = vunpack.c.l.bf16 %v1713_v30 }
 0x179   : > { %v2494_v27 = vadd.f32 %v1128_v6, %v1019_v53  ;;  %v1237_v17 = vpop.f32.mrb[70].mxu1  ;;  %v1923_v1 = vpop.f32.mrb[71].mxu0 }
 0x17a   : > { %v1274_v10 = vadd.f32 %v1237_v17, %v1133_v8  ;;  %v1929_v43 = vpop.f32.mrb[71].mxu1 }
 0x17b   : > { %v1703_v43 = vunpack.c.h.bf16 %v1713_v30 }
 0x17e   : > { %v1353_v58 = vpop.f32.mrb[72].mxu0 }
 0x17f   : > { %v1242_v51 = vpop.f32.mrb[72].mxu1  ;;  %v1392_v29 = vadd.f32 %v1353_v58, %v1273_v48  ;;  %v1950_v26 = vpop.f32.mrb[73].mxu0 }
 0x180   : > { %v1275_v15 = vadd.f32 %v1242_v51, %v1134_v14  ;;  %v1932_v54 = vpop.f32.mrb[73].mxu1  ;;  %v1356_v61 = vpop.f32.mrb[74].mxu0 }
 0x181   : > { %v1409_v46 = vadd.f32 %v2507_v49, %v1392_v29  ;;  %v1245_v62 = vpop.f32.mrb[74].mxu1  ;;  %v1393_v8 = vadd.f32 %v1356_v61, %v1274_v10  ;;  %v1951_v39 = vpop.f32.mrb[75].mxu0 }
 0x182   : > { %v1276_v22 = vadd.f32 %v1245_v62, %v1135_v55  ;;  %v1933_v56 = vpop.f32.mrb[75].mxu1 }
 0x183   : > { %v1439_v34 = vadd.f32 %v1694_v9, %v1409_v46  ;;  %v1410_v63 = vadd.f32 %v2507_v49, %v1393_v8  ;;  %v1714_v9 = vld [vmem:[%s2501_s18 + $0x18] sm:$0xff]  }
 0x185   : > { %v1449_v19 = vmax.f32 %v1439_v34, 0.0  ;;  %v1440_v7 = vadd.f32 %v1695_v35, %v1410_v63  ;;  %v1706_v35 = vunpack.c.l.bf16 %v1714_v9 }
 0x186   : > { %v1361_v14 = vpop.f32.mrb[76].mxu0 }
 0x187   : > { %v1682_v45 = vpack.c.bf16 %v1449_v19, %v1449_v19  ;;  %v1450_v41 = vmax.f32 %v1440_v7, 0.0  ;;  %v1250_v59 = vpop.f32.mrb[76].mxu1  ;;  %v1394_v55 = vadd.f32 %v1361_v14, %v1275_v15  ;;  %v1954_v12 = vpop.f32.mrb[77].mxu0  ;;  %v1707_v7 = vunpack.c.h.bf16 %v1714_v9 }
 0x188   : > { %v1277_v5 = vadd.f32 %v1250_v59, %v2483_v21  ;;  %v1936_v52 = vpop.f32.mrb[77].mxu1  ;;  %v1364_v25 = vpop.f32.mrb[78].mxu0 }
 0x189   : > { %1500 = vst.msk [vmem:[%s2517_s23] sm:$0xf] %vm1499_vm8, %v1682_v45  ;;  %v1683_v3 = vpack.c.bf16 %v1450_v41, %v1450_v41  ;;  %v1411_v16 = vadd.f32 %v2507_v49, %v1394_v55  ;;  %v1253_v28 = vpop.f32.mrb[78].mxu1  ;;  %v1395_v20 = vadd.f32 %v1364_v25, %v1276_v22  ;;  %v1955_v24 = vpop.f32.mrb[79].mxu0  ;;  %v1715_v55 = vld [vmem:[%s2501_s18 + $0x20] sm:$0xff]  }
 0x18a   : > { %v1278_v37 = vadd.f32 %v1253_v28, %v2485_v32  ;;  %v1937_v42 = vpop.f32.mrb[79].mxu1 }
 0x18b   : > { %1501 = vst.msk [vmem:[%s2517_s23 + $0x4] sm:$0xf] %vm1499_vm8, %v1683_v3  ;;  %v1441_v36 = vadd.f32 %v1698_v4, %v1411_v16  ;;  %v1412_v21 = vadd.f32 %v2507_v49, %v1395_v20  ;;  %v1710_v16 = vunpack.c.l.bf16 %v1715_v55 }
 0x18d   : > { %v1451_v0 = vmax.f32 %v1441_v36, 0.0  ;;  %v1442_v33 = vadd.f32 %v1699_v13, %v1412_v21 }
 0x18e   : > { %v1369_v40 = vpop.f32.mrb[80].mxu0 }
 0x18f   : > { %v1684_v38 = vpack.c.bf16 %v1451_v0, %v1451_v0  ;;  %v1452_v53 = vmax.f32 %v1442_v33, 0.0  ;;  %v1258_v50 = vpop.f32.mrb[80].mxu1  ;;  %v1396_v57 = vadd.f32 %v1369_v40, %v1277_v5  ;;  %v1958_v11 = vpop.f32.mrb[81].mxu0 }
 0x190   : > { %v1279_v32 = vadd.f32 %v1258_v50, %v2487_v60  ;;  %v1940_v48 = vpop.f32.mrb[81].mxu1  ;;  %v1372_v23 = vpop.f32.mrb[82].mxu0 }
 0x191   : > { %1502 = vst.msk [vmem:[%s2517_s23 + $0x8] sm:$0xf] %vm1499_vm8, %v1684_v38  ;;  %v1685_v6 = vpack.c.bf16 %v1452_v53, %v1452_v53  ;;  %v1413_v17 = vadd.f32 %v2507_v49, %v1396_v57  ;;  %v1261_v1 = vpop.f32.mrb[82].mxu1  ;;  %v1397_v10 = vadd.f32 %v1372_v23, %v1278_v37  ;;  %v1959_v44 = vpop.f32.mrb[83].mxu0  ;;  %v1711_v37 = vunpack.c.h.bf16 %v1715_v55 }
 0x192   : > { %v1280_v58 = vadd.f32 %v1261_v1, %v2489_v31  ;;  %v1941_v51 = vpop.f32.mrb[83].mxu1 }
 0x193   : > { %1503 = vst.msk [vmem:[%s2517_s23 + $0xc] sm:$0xf] %vm1499_vm8, %v1685_v6  ;;  %v1443_v29 = vadd.f32 %v1702_v47, %v1413_v17  ;;  %v1414_v60 = vadd.f32 %v2507_v49, %v1397_v10 }
 0x195   : > { %v1453_v26 = vmax.f32 %v1443_v29, 0.0  ;;  %v1444_v15 = vadd.f32 %v1703_v43, %v1414_v60 }
 0x196   : > { %v1377_v54 = vpop.f32.mrb[84].mxu0 }
 0x197   : > { %v1686_v61 = vpack.c.bf16 %v1453_v26, %v1453_v26  ;;  %v1454_v46 = vmax.f32 %v1444_v15, 0.0  ;;  %v1266_v62 = vpop.f32.mrb[84].mxu1  ;;  %v1398_v8 = vadd.f32 %v1377_v54, %v1279_v32  ;;  %v1962_v39 = vpop.f32.mrb[85].mxu0 }
 0x198   : > { %v1281_v31 = vadd.f32 %v1266_v62, %v2492_v2  ;;  %v1944_v22 = vpop.f32.mrb[85].mxu1  ;;  %v1380_v56 = vpop.f32.mrb[86].mxu0 }
 0x199   : > { %1504 = vst.msk [vmem:[%s2517_s23 + $0x10] sm:$0xf] %vm1499_vm8, %v1686_v61  ;;  %v1687_v34 = vpack.c.bf16 %v1454_v46, %v1454_v46  ;;  %v1415_v63 = vadd.f32 %v2507_v49, %v1398_v8  ;;  %v1269_v18 = vpop.f32.mrb[86].mxu1  ;;  %v1399_v19 = vadd.f32 %v1380_v56, %v1280_v58  ;;  %v1963_v14 = vpop.f32.mrb[87].mxu0 }
 0x19a   : > { %v1282_v45 = vadd.f32 %v1269_v18, %v2494_v27  ;;  %v1945_v41 = vpop.f32.mrb[87].mxu1 }
 0x19b   : > { %1505 = vst.msk [vmem:[%s2517_s23 + $0x14] sm:$0xf] %vm1499_vm8, %v1687_v34  ;;  %v1445_v59 = vadd.f32 %v1706_v35, %v1415_v63  ;;  %v1416_v2 = vadd.f32 %v2507_v49, %v1399_v19 }
 0x19d   : > { %v1455_v4 = vmax.f32 %v1445_v59, 0.0  ;;  %v1446_v12 = vadd.f32 %v1707_v7, %v1416_v2 }
 0x19e   : > { %v1385_v5 = vpop.f32.mrb[88].mxu0 }
 0x19f   : > { %v1688_v52 = vpack.c.bf16 %v1455_v4, %v1455_v4  ;;  %v1456_v25 = vmax.f32 %v1446_v12, 0.0  ;;  %v1400_v3 = vadd.f32 %v1385_v5, %v1281_v31  ;;  %v1966_v28 = vpop.f32.mrb[89].mxu0 }
 0x1a0   : > { %v1388_v20 = vpop.f32.mrb[90].mxu0 }
 0x1a1   : > { %1506 = vst.msk [vmem:[%s2517_s23 + $0x18] sm:$0xf] %vm1499_vm8, %v1688_v52  ;;  %v1689_v27 = vpack.c.bf16 %v1456_v25, %v1456_v25  ;;  %v1417_v13 = vadd.f32 %v2507_v49, %v1400_v3  ;;  %v1401_v24 = vadd.f32 %v1388_v20, %v1282_v45  ;;  %v1967_v42 = vpop.f32.mrb[91].mxu0 }
 0x1a3   : > { %1507 = vst.msk [vmem:[%s2517_s23 + $0x1c] sm:$0xf] %vm1499_vm8, %v1689_v27  ;;  %v1447_v36 = vadd.f32 %v1710_v16, %v1417_v13  ;;  %v1418_v21 = vadd.f32 %v2507_v49, %v1401_v24 }
 0x1a5   : > { %v1457_v30 = vmax.f32 %v1447_v36, 0.0  ;;  %v1448_v0 = vadd.f32 %v1711_v37, %v1418_v21 }
 0x1a7   : > { %v1690_v33 = vpack.c.bf16 %v1457_v30, %v1457_v30  ;;  %v1458_v40 = vmax.f32 %v1448_v0, 0.0 }
 0x1a9   : > { %1508 = vst.msk [vmem:[%s2517_s23 + $0x20] sm:$0xf] %vm1499_vm8, %v1690_v33  ;;  %v1691_v38 = vpack.c.bf16 %v1458_v40, %v1458_v40 }
 0x1ab   : > { %1509 = vst.msk [vmem:[%s2517_s23 + $0x24] sm:$0xf] %vm1499_vm8, %v1691_v38 }
 0x1ac PF: > { %s14_s15 = sadd.s32 1, %s2011_s15  }
 0x1ad   : > { %p11_p4 = scmp.ge.s32.totalorder %s14_s15, 4  }
 0x1af   :  { %13 = sbr.rel (!%p11_p4) target bundleno = 1 (0x1), region = 77 }

</bundles_post_ra>
